<compile_context>
chip_gen: v5e
topology: v5e:2x2
jax: 0.10.0
libtpu: 0.0.40
codegen_flags: <defaults>
</compile_context>

<pallas_src>
import jax
import jax.numpy as jnp
from jax.experimental import pallas as pl
from jax.experimental.pallas import tpu as pltpu

LANE = 128
SUBLANE = 8


def rnn_unit_kernel(x_ref, h_prev_ref,
                    w_enc_ref, b_enc_ref,
                    w_ih0_ref, w_hh0_ref, b_rnn0_ref,
                    w_ih1_ref, w_hh1_ref, b_rnn1_ref,
                    w_dec_ref, b_dec_ref,
                    out_ref, h_out_ref):
    """Single-invocation kernel: hoisted encoder + layer-0 input projection,
    vreg-carried 2-layer tanh recurrence over L timesteps (statically unrolled),
    hoisted decoder with one lane-dense bulk store. Batch is sublane-padded (8)."""
    LB = x_ref.shape[0]
    _, B, H = h_prev_ref.shape           # B is already padded to a multiple of 8
    L = LB // B

    # ---- Hoisted pre-recurrence work (two batched matmuls, M = L*B) ----
    # encoder: (L*B, F) @ (F, I) + b_enc
    e = (jnp.dot(x_ref[...], w_enc_ref[...], preferred_element_type=jnp.float32)
         + b_enc_ref[...])                                              # (L*B, I)
    # layer-0 input-to-hidden contribution for all timesteps, bias folded in
    ei0 = (jnp.dot(e, w_ih0_ref[...], preferred_element_type=jnp.float32)
           + b_rnn0_ref[...])                                           # (L*B, H)
    # TODO(synk): at large L*B, cast the three hoisted GEMMs (encoder / ih0 / decoder)
    # to bf16 inputs with f32 accumulation for MXU peak (requires relaxing tolerance).

    w_hh0 = w_hh0_ref[...]                                              # (H, H)
    w_ih1 = w_ih1_ref[...]                                              # (H, H)
    w_hh1 = w_hh1_ref[...]                                              # (H, H)
    # hoist the bias broadcast out of the unrolled loop (no broadcast_in_dim per step)
    b1 = jnp.broadcast_to(b_rnn1_ref[...], (B, H))

    # Recurrent state lives in vregs, not VMEM.
    h0 = h_prev_ref[0]                                                  # (B, H)
    h1 = h_prev_ref[1]                                                  # (B, H)

    h1_steps = []
    for t in range(L):  # static unroll: L is small and known at trace time
        # layer 0: hidden-to-hidden dot + precomputed sublane-aligned ei0 tile
        h0 = jnp.tanh(jnp.dot(h0, w_hh0, preferred_element_type=jnp.float32)
                      + ei0[t * B:(t + 1) * B, :])
        # layer 1: two independent MXU dots summed (no per-step lane concat)
        h1 = jnp.tanh(jnp.dot(h0, w_ih1, preferred_element_type=jnp.float32)
                      + jnp.dot(h1, w_hh1, preferred_element_type=jnp.float32)
                      + b1)
        h1_steps.append(h1)
    # TODO(synk): for large L, write each step's h1 into a (L, 8, H) VMEM scratch instead
    # of a Python list in vregs (live ranges of L tiles would exceed the 64-vreg file).

    # final hidden state: one aligned store (no masked partial vst's)
    h_out_ref[...] = jnp.stack([h0, h1], axis=0)

    # ---- Hoisted decoder: one (L*B, H) @ (H, F_pad) matmul + one bulk store ----
    hs = jnp.concatenate(h1_steps, axis=0)                              # (L*B, H)
    out_ref[...] = (jnp.dot(hs, w_dec_ref[...], preferred_element_type=jnp.float32)
                    + b_dec_ref[...])


def init_params(key, features, input_size, hidden_size):
    """Deterministic synthetic parameters in native PyTorch nn.Linear / nn.RNN layout."""
    ks = jax.random.split(key, 12)

    def unif(k, shape, fan_in):
        bound = 1.0 / jnp.sqrt(jnp.float32(fan_in))
        return jax.random.uniform(k, shape, jnp.float32, -bound, bound)

    return dict(
        # encoder Linear(features, input_size): W (I, F), b (I,)
        w_enc=unif(ks[0], (input_size, features), features),
        b_enc=unif(ks[1], (input_size,), features),
        # RNN layer 0
        w_ih0=unif(ks[2], (hidden_size, input_size), hidden_size),
        w_hh0=unif(ks[3], (hidden_size, hidden_size), hidden_size),
        b_ih0=unif(ks[4], (hidden_size,), hidden_size),
        b_hh0=unif(ks[5], (hidden_size,), hidden_size),
        # RNN layer 1
        w_ih1=unif(ks[6], (hidden_size, hidden_size), hidden_size),
        w_hh1=unif(ks[7], (hidden_size, hidden_size), hidden_size),
        b_ih1=unif(ks[8], (hidden_size,), hidden_size),
        b_hh1=unif(ks[9], (hidden_size,), hidden_size),
        # decoder Linear(hidden_size, features): W (F, H), b (F,)
        w_dec=unif(ks[10], (features, hidden_size), hidden_size),
        b_dec=unif(ks[11], (features,), hidden_size),
    )


def _pad_lanes(a, n=LANE):
    pad = (-a.shape[-1]) % n
    if pad == 0:
        return a
    return jnp.pad(a, [(0, 0)] * (a.ndim - 1) + [(0, pad)])


def prepare_kernel_params(p):
    """Kernel-facing layout: pre-transposed weights, folded RNN bias pairs,
    separate (un-fused) layer-1 weights, and a lane-padded (128-wide) decoder."""
    return dict(
        w_enc_T=p['w_enc'].T,                                     # (F, I)
        b_enc=p['b_enc'].reshape(1, -1),                          # (1, I)
        w_ih0_T=p['w_ih0'].T,                                     # (I, H)
        w_hh0_T=p['w_hh0'].T,                                     # (H, H)
        b_rnn0=(p['b_ih0'] + p['b_hh0']).reshape(1, -1),          # (1, H)
        w_ih1_T=p['w_ih1'].T,                                     # (H, H)
        w_hh1_T=p['w_hh1'].T,                                     # (H, H)
        b_rnn1=(p['b_ih1'] + p['b_hh1']).reshape(1, -1),          # (1, H)
        w_dec_T=_pad_lanes(p['w_dec'].T),                         # (H, F_pad)
        b_dec=_pad_lanes(p['b_dec'].reshape(1, -1)),              # (1, F_pad)
    )
    # TODO(synk): at large L*B, drop the F->128 lane padding of the decoder (32x write
    # amplification makes the kernel HBM-write-bound) and emit the unpadded output.


def rnn_unit_forward(x, prev_hidden, kp):
    L, B, F = x.shape
    num_layers, _, H = prev_hidden.shape
    F_pad = kp['w_dec_T'].shape[1]

    # Sublane-pad the batch to a full 8-row group: every per-step slice / stack / store in
    # the kernel becomes vreg-aligned. Padded rows are zeros and fully independent (the
    # recurrence is row-wise), so they never contaminate the real rows.
    B_pad = -(-B // SUBLANE) * SUBLANE
    if B_pad != B:
        x = jnp.pad(x, ((0, 0), (0, B_pad - B), (0, 0)))
        prev_hidden = jnp.pad(prev_hidden, ((0, 0), (0, B_pad - B), (0, 0)))

    x2d = x.reshape(L * B_pad, F)   # same flatten the PyTorch forward does

    vmem = pl.BlockSpec(memory_space=pltpu.MemorySpace.VMEM)
    out_shape = (jax.ShapeDtypeStruct((L * B_pad, F_pad), jnp.float32),
                 jax.ShapeDtypeStruct((num_layers, B_pad, H), jnp.float32))

    out2d, h_out = pl.pallas_call(
        rnn_unit_kernel,
        out_shape=out_shape,
        in_specs=[vmem] * 12,
        out_specs=(vmem, vmem),
    )(x2d, prev_hidden,
      kp['w_enc_T'], kp['b_enc'],
      kp['w_ih0_T'], kp['w_hh0_T'], kp['b_rnn0'],
      kp['w_ih1_T'], kp['w_hh1_T'], kp['b_rnn1'],
      kp['w_dec_T'], kp['b_dec'])

    # drop lane padding of the decoder output / sublane padding of the batch
    out = out2d[:, :F].reshape(L, B_pad, F)[:, :B, :]
    return out, h_out[:, :B, :]
    # TODO(synk): at scale (large L*B), add a grid over L*B chunks with BlockSpecs for
    # x2d / ei0 / the decoder output ("parallel" chunk axis for the 2 v7x TensorCores,
    # recurrence on an "arbitrary" axis) and set vmem_limit_bytes, instead of keeping
    # everything fully VMEM-resident (v7x 64 MiB ceiling, 32 MiB default scoped limit).


def rnn_unit_reference(x, prev_hidden, p):
    """Pure-JAX reference mirroring the PyTorch forward (unfused weights)."""
    L, B, F = x.shape
    e = x.reshape(L * B, F) @ p['w_enc'].T + p['b_enc']
    e = e.reshape(L, B, -1)
    h0, h1 = prev_hidden[0], prev_hidden[1]
    outs = []
    for t in range(L):
        h0 = jnp.tanh(e[t] @ p['w_ih0'].T + p['b_ih0'] + h0 @ p['w_hh0'].T + p['b_hh0'])
        h1 = jnp.tanh(h0 @ p['w_ih1'].T + p['b_ih1'] + h1 @ p['w_hh1'].T + p['b_hh1'])
        outs.append(h1)
    out = jnp.stack(outs, axis=0)                                   # (L, B, H)
    dec = out.reshape(L * B, -1) @ p['w_dec'].T + p['b_dec']
    return dec.reshape(L, B, F), jnp.stack([h0, h1], axis=0)


if __name__ == "__main__":
    features, input_size, hidden_size, num_layers = 4, 32, 32, 2
    L, B = 8, 2

    key = jax.random.PRNGKey(0)
    k_x, k_h, k_p = jax.random.split(key, 3)
    x = jax.random.normal(k_x, (L, B, features), jnp.float32)
    prev_hidden = jax.random.normal(k_h, (num_layers, B, hidden_size), jnp.float32)
    params = init_params(k_p, features, input_size, hidden_size)
    kparams = prepare_kernel_params(params)

    out, cur_hidden = rnn_unit_forward(x, prev_hidden, kparams)
    out = jax.block_until_ready(out)
    cur_hidden = jax.block_until_ready(cur_hidden)

    ref_out, ref_hidden = rnn_unit_reference(x, prev_hidden, params)
    assert out.shape == (L, B, features)
    assert cur_hidden.shape == (num_layers, B, hidden_size)
    assert jnp.allclose(out, ref_out, atol=1e-5, rtol=1e-5)
    assert jnp.allclose(cur_hidden, ref_hidden, atol=1e-5, rtol=1e-5)

    print("KERNEL_OK")
</pallas_src>

<mosaic_0001>
module attributes {stable_mosaic.version = 11 : i64} {
  func.func @rnn_unit_kernel(%arg0: memref<64x4xf32, #tpu.memory_space<vmem>>, %arg1: memref<2x8x32xf32, #tpu.memory_space<vmem>>, %arg2: memref<4x32xf32, #tpu.memory_space<vmem>>, %arg3: memref<1x32xf32, #tpu.memory_space<vmem>>, %arg4: memref<32x32xf32, #tpu.memory_space<vmem>>, %arg5: memref<32x32xf32, #tpu.memory_space<vmem>>, %arg6: memref<1x32xf32, #tpu.memory_space<vmem>>, %arg7: memref<32x32xf32, #tpu.memory_space<vmem>>, %arg8: memref<32x32xf32, #tpu.memory_space<vmem>>, %arg9: memref<1x32xf32, #tpu.memory_space<vmem>>, %arg10: memref<32x128xf32, #tpu.memory_space<vmem>>, %arg11: memref<1x128xf32, #tpu.memory_space<vmem>>, %arg12: memref<64x128xf32, #tpu.memory_space<vmem>>, %arg13: memref<2x8x32xf32, #tpu.memory_space<vmem>>) attributes {dimension_semantics = [], scalar_prefetch = 0 : i64, scratch_operands = 0 : i64, tpu.core_type = #tpu.core_type<tc>} {
    %c0 = arith.constant 0 : index
    %c0_0 = arith.constant 0 : index
    %0 = vector.load %arg0[%c0, %c0_0] : memref<64x4xf32, #tpu.memory_space<vmem>>, vector<64x4xf32>
    %c0_1 = arith.constant 0 : index
    %c0_2 = arith.constant 0 : index
    %1 = vector.load %arg2[%c0_1, %c0_2] : memref<4x32xf32, #tpu.memory_space<vmem>>, vector<4x32xf32>
    %cst = arith.constant dense<0.000000e+00> : vector<64x32xf32>
    %2 = tpu.matmul %0, %1, %cst {dimension_numbers = #tpu.dot_dimension_numbers<[1], [0], [0], [1], [0, 0, 1, 1], [], []>} : vector<64x4xf32>, vector<4x32xf32>, vector<64x32xf32> -> vector<64x32xf32>
    %c0_3 = arith.constant 0 : index
    %c0_4 = arith.constant 0 : index
    %3 = vector.load %arg3[%c0_3, %c0_4] : memref<1x32xf32, #tpu.memory_space<vmem>>, vector<1x32xf32>
    %4 = vector.broadcast %3 : vector<1x32xf32> to vector<64x32xf32>
    %5 = arith.addf %2, %4 : vector<64x32xf32>
    %c0_5 = arith.constant 0 : index
    %c0_6 = arith.constant 0 : index
    %6 = vector.load %arg4[%c0_5, %c0_6] : memref<32x32xf32, #tpu.memory_space<vmem>>, vector<32x32xf32>
    %cst_7 = arith.constant dense<0.000000e+00> : vector<64x32xf32>
    %7 = tpu.matmul %5, %6, %cst_7 {dimension_numbers = #tpu.dot_dimension_numbers<[1], [0], [0], [1], [0, 0, 1, 1], [], []>} : vector<64x32xf32>, vector<32x32xf32>, vector<64x32xf32> -> vector<64x32xf32>
    %c0_8 = arith.constant 0 : index
    %c0_9 = arith.constant 0 : index
    %8 = vector.load %arg6[%c0_8, %c0_9] : memref<1x32xf32, #tpu.memory_space<vmem>>, vector<1x32xf32>
    %9 = vector.broadcast %8 : vector<1x32xf32> to vector<64x32xf32>
    %10 = arith.addf %7, %9 : vector<64x32xf32>
    %c0_10 = arith.constant 0 : index
    %c0_11 = arith.constant 0 : index
    %11 = vector.load %arg5[%c0_10, %c0_11] : memref<32x32xf32, #tpu.memory_space<vmem>>, vector<32x32xf32>
    %c0_12 = arith.constant 0 : index
    %c0_13 = arith.constant 0 : index
    %12 = vector.load %arg7[%c0_12, %c0_13] : memref<32x32xf32, #tpu.memory_space<vmem>>, vector<32x32xf32>
    %c0_14 = arith.constant 0 : index
    %c0_15 = arith.constant 0 : index
    %13 = vector.load %arg8[%c0_14, %c0_15] : memref<32x32xf32, #tpu.memory_space<vmem>>, vector<32x32xf32>
    %c0_16 = arith.constant 0 : index
    %c0_17 = arith.constant 0 : index
    %14 = vector.load %arg9[%c0_16, %c0_17] : memref<1x32xf32, #tpu.memory_space<vmem>>, vector<1x32xf32>
    %15 = vector.shape_cast %14 : vector<1x32xf32> to vector<1x32xf32>
    %16 = vector.broadcast %15 : vector<1x32xf32> to vector<8x32xf32>
    %c0_18 = arith.constant 0 : index
    %c0_19 = arith.constant 0 : index
    %c0_20 = arith.constant 0 : index
    %17 = vector.load %arg1[%c0_18, %c0_19, %c0_20] : memref<2x8x32xf32, #tpu.memory_space<vmem>>, vector<1x8x32xf32>
    %18 = vector.shape_cast %17 : vector<1x8x32xf32> to vector<8x32xf32>
    %c1 = arith.constant 1 : index
    %c0_21 = arith.constant 0 : index
    %c0_22 = arith.constant 0 : index
    %19 = vector.load %arg1[%c1, %c0_21, %c0_22] : memref<2x8x32xf32, #tpu.memory_space<vmem>>, vector<1x8x32xf32>
    %20 = vector.shape_cast %19 : vector<1x8x32xf32> to vector<8x32xf32>
    %cst_23 = arith.constant dense<0.000000e+00> : vector<8x32xf32>
    %21 = tpu.matmul %18, %11, %cst_23 {dimension_numbers = #tpu.dot_dimension_numbers<[1], [0], [0], [1], [0, 0, 1, 1], [], []>} : vector<8x32xf32>, vector<32x32xf32>, vector<8x32xf32> -> vector<8x32xf32>
    %22 = vector.extract_strided_slice %10 {offsets = [0, 0], sizes = [8, 32], strides = [1, 1]} : vector<64x32xf32> to vector<8x32xf32>
    %23 = arith.addf %21, %22 : vector<8x32xf32>
    %24 = math.tanh %23 : vector<8x32xf32>
    %cst_24 = arith.constant dense<0.000000e+00> : vector<8x32xf32>
    %25 = tpu.matmul %24, %12, %cst_24 {dimension_numbers = #tpu.dot_dimension_numbers<[1], [0], [0], [1], [0, 0, 1, 1], [], []>} : vector<8x32xf32>, vector<32x32xf32>, vector<8x32xf32> -> vector<8x32xf32>
    %cst_25 = arith.constant dense<0.000000e+00> : vector<8x32xf32>
    %26 = tpu.matmul %20, %13, %cst_25 {dimension_numbers = #tpu.dot_dimension_numbers<[1], [0], [0], [1], [0, 0, 1, 1], [], []>} : vector<8x32xf32>, vector<32x32xf32>, vector<8x32xf32> -> vector<8x32xf32>
    %27 = arith.addf %25, %26 : vector<8x32xf32>
    %28 = arith.addf %27, %16 : vector<8x32xf32>
    %29 = math.tanh %28 : vector<8x32xf32>
    %cst_26 = arith.constant dense<0.000000e+00> : vector<8x32xf32>
    %30 = tpu.matmul %24, %11, %cst_26 {dimension_numbers = #tpu.dot_dimension_numbers<[1], [0], [0], [1], [0, 0, 1, 1], [], []>} : vector<8x32xf32>, vector<32x32xf32>, vector<8x32xf32> -> vector<8x32xf32>
    %31 = vector.extract_strided_slice %10 {offsets = [8, 0], sizes = [8, 32], strides = [1, 1]} : vector<64x32xf32> to vector<8x32xf32>
    %32 = arith.addf %30, %31 : vector<8x32xf32>
    %33 = math.tanh %32 : vector<8x32xf32>
    %cst_27 = arith.constant dense<0.000000e+00> : vector<8x32xf32>
    %34 = tpu.matmul %33, %12, %cst_27 {dimension_numbers = #tpu.dot_dimension_numbers<[1], [0], [0], [1], [0, 0, 1, 1], [], []>} : vector<8x32xf32>, vector<32x32xf32>, vector<8x32xf32> -> vector<8x32xf32>
    %cst_28 = arith.constant dense<0.000000e+00> : vector<8x32xf32>
    %35 = tpu.matmul %29, %13, %cst_28 {dimension_numbers = #tpu.dot_dimension_numbers<[1], [0], [0], [1], [0, 0, 1, 1], [], []>} : vector<8x32xf32>, vector<32x32xf32>, vector<8x32xf32> -> vector<8x32xf32>
    %36 = arith.addf %34, %35 : vector<8x32xf32>
    %37 = arith.addf %36, %16 : vector<8x32xf32>
    %38 = math.tanh %37 : vector<8x32xf32>
    %cst_29 = arith.constant dense<0.000000e+00> : vector<8x32xf32>
    %39 = tpu.matmul %33, %11, %cst_29 {dimension_numbers = #tpu.dot_dimension_numbers<[1], [0], [0], [1], [0, 0, 1, 1], [], []>} : vector<8x32xf32>, vector<32x32xf32>, vector<8x32xf32> -> vector<8x32xf32>
    %40 = vector.extract_strided_slice %10 {offsets = [16, 0], sizes = [8, 32], strides = [1, 1]} : vector<64x32xf32> to vector<8x32xf32>
    %41 = arith.addf %39, %40 : vector<8x32xf32>
    %42 = math.tanh %41 : vector<8x32xf32>
    %cst_30 = arith.constant dense<0.000000e+00> : vector<8x32xf32>
    %43 = tpu.matmul %42, %12, %cst_30 {dimension_numbers = #tpu.dot_dimension_numbers<[1], [0], [0], [1], [0, 0, 1, 1], [], []>} : vector<8x32xf32>, vector<32x32xf32>, vector<8x32xf32> -> vector<8x32xf32>
    %cst_31 = arith.constant dense<0.000000e+00> : vector<8x32xf32>
    %44 = tpu.matmul %38, %13, %cst_31 {dimension_numbers = #tpu.dot_dimension_numbers<[1], [0], [0], [1], [0, 0, 1, 1], [], []>} : vector<8x32xf32>, vector<32x32xf32>, vector<8x32xf32> -> vector<8x32xf32>
    %45 = arith.addf %43, %44 : vector<8x32xf32>
    %46 = arith.addf %45, %16 : vector<8x32xf32>
    %47 = math.tanh %46 : vector<8x32xf32>
    %cst_32 = arith.constant dense<0.000000e+00> : vector<8x32xf32>
    %48 = tpu.matmul %42, %11, %cst_32 {dimension_numbers = #tpu.dot_dimension_numbers<[1], [0], [0], [1], [0, 0, 1, 1], [], []>} : vector<8x32xf32>, vector<32x32xf32>, vector<8x32xf32> -> vector<8x32xf32>
    %49 = vector.extract_strided_slice %10 {offsets = [24, 0], sizes = [8, 32], strides = [1, 1]} : vector<64x32xf32> to vector<8x32xf32>
    %50 = arith.addf %48, %49 : vector<8x32xf32>
    %51 = math.tanh %50 : vector<8x32xf32>
    %cst_33 = arith.constant dense<0.000000e+00> : vector<8x32xf32>
    %52 = tpu.matmul %51, %12, %cst_33 {dimension_numbers = #tpu.dot_dimension_numbers<[1], [0], [0], [1], [0, 0, 1, 1], [], []>} : vector<8x32xf32>, vector<32x32xf32>, vector<8x32xf32> -> vector<8x32xf32>
    %cst_34 = arith.constant dense<0.000000e+00> : vector<8x32xf32>
    %53 = tpu.matmul %47, %13, %cst_34 {dimension_numbers = #tpu.dot_dimension_numbers<[1], [0], [0], [1], [0, 0, 1, 1], [], []>} : vector<8x32xf32>, vector<32x32xf32>, vector<8x32xf32> -> vector<8x32xf32>
    %54 = arith.addf %52, %53 : vector<8x32xf32>
    %55 = arith.addf %54, %16 : vector<8x32xf32>
    %56 = math.tanh %55 : vector<8x32xf32>
    %cst_35 = arith.constant dense<0.000000e+00> : vector<8x32xf32>
    %57 = tpu.matmul %51, %11, %cst_35 {dimension_numbers = #tpu.dot_dimension_numbers<[1], [0], [0], [1], [0, 0, 1, 1], [], []>} : vector<8x32xf32>, vector<32x32xf32>, vector<8x32xf32> -> vector<8x32xf32>
    %58 = vector.extract_strided_slice %10 {offsets = [32, 0], sizes = [8, 32], strides = [1, 1]} : vector<64x32xf32> to vector<8x32xf32>
    %59 = arith.addf %57, %58 : vector<8x32xf32>
    %60 = math.tanh %59 : vector<8x32xf32>
    %cst_36 = arith.constant dense<0.000000e+00> : vector<8x32xf32>
    %61 = tpu.matmul %60, %12, %cst_36 {dimension_numbers = #tpu.dot_dimension_numbers<[1], [0], [0], [1], [0, 0, 1, 1], [], []>} : vector<8x32xf32>, vector<32x32xf32>, vector<8x32xf32> -> vector<8x32xf32>
    %cst_37 = arith.constant dense<0.000000e+00> : vector<8x32xf32>
    %62 = tpu.matmul %56, %13, %cst_37 {dimension_numbers = #tpu.dot_dimension_numbers<[1], [0], [0], [1], [0, 0, 1, 1], [], []>} : vector<8x32xf32>, vector<32x32xf32>, vector<8x32xf32> -> vector<8x32xf32>
    %63 = arith.addf %61, %62 : vector<8x32xf32>
    %64 = arith.addf %63, %16 : vector<8x32xf32>
    %65 = math.tanh %64 : vector<8x32xf32>
    %cst_38 = arith.constant dense<0.000000e+00> : vector<8x32xf32>
    %66 = tpu.matmul %60, %11, %cst_38 {dimension_numbers = #tpu.dot_dimension_numbers<[1], [0], [0], [1], [0, 0, 1, 1], [], []>} : vector<8x32xf32>, vector<32x32xf32>, vector<8x32xf32> -> vector<8x32xf32>
    %67 = vector.extract_strided_slice %10 {offsets = [40, 0], sizes = [8, 32], strides = [1, 1]} : vector<64x32xf32> to vector<8x32xf32>
    %68 = arith.addf %66, %67 : vector<8x32xf32>
    %69 = math.tanh %68 : vector<8x32xf32>
    %cst_39 = arith.constant dense<0.000000e+00> : vector<8x32xf32>
    %70 = tpu.matmul %69, %12, %cst_39 {dimension_numbers = #tpu.dot_dimension_numbers<[1], [0], [0], [1], [0, 0, 1, 1], [], []>} : vector<8x32xf32>, vector<32x32xf32>, vector<8x32xf32> -> vector<8x32xf32>
    %cst_40 = arith.constant dense<0.000000e+00> : vector<8x32xf32>
    %71 = tpu.matmul %65, %13, %cst_40 {dimension_numbers = #tpu.dot_dimension_numbers<[1], [0], [0], [1], [0, 0, 1, 1], [], []>} : vector<8x32xf32>, vector<32x32xf32>, vector<8x32xf32> -> vector<8x32xf32>
    %72 = arith.addf %70, %71 : vector<8x32xf32>
    %73 = arith.addf %72, %16 : vector<8x32xf32>
    %74 = math.tanh %73 : vector<8x32xf32>
    %cst_41 = arith.constant dense<0.000000e+00> : vector<8x32xf32>
    %75 = tpu.matmul %69, %11, %cst_41 {dimension_numbers = #tpu.dot_dimension_numbers<[1], [0], [0], [1], [0, 0, 1, 1], [], []>} : vector<8x32xf32>, vector<32x32xf32>, vector<8x32xf32> -> vector<8x32xf32>
    %76 = vector.extract_strided_slice %10 {offsets = [48, 0], sizes = [8, 32], strides = [1, 1]} : vector<64x32xf32> to vector<8x32xf32>
    %77 = arith.addf %75, %76 : vector<8x32xf32>
    %78 = math.tanh %77 : vector<8x32xf32>
    %cst_42 = arith.constant dense<0.000000e+00> : vector<8x32xf32>
    %79 = tpu.matmul %78, %12, %cst_42 {dimension_numbers = #tpu.dot_dimension_numbers<[1], [0], [0], [1], [0, 0, 1, 1], [], []>} : vector<8x32xf32>, vector<32x32xf32>, vector<8x32xf32> -> vector<8x32xf32>
    %cst_43 = arith.constant dense<0.000000e+00> : vector<8x32xf32>
    %80 = tpu.matmul %74, %13, %cst_43 {dimension_numbers = #tpu.dot_dimension_numbers<[1], [0], [0], [1], [0, 0, 1, 1], [], []>} : vector<8x32xf32>, vector<32x32xf32>, vector<8x32xf32> -> vector<8x32xf32>
    %81 = arith.addf %79, %80 : vector<8x32xf32>
    %82 = arith.addf %81, %16 : vector<8x32xf32>
    %83 = math.tanh %82 : vector<8x32xf32>
    %cst_44 = arith.constant dense<0.000000e+00> : vector<8x32xf32>
    %84 = tpu.matmul %78, %11, %cst_44 {dimension_numbers = #tpu.dot_dimension_numbers<[1], [0], [0], [1], [0, 0, 1, 1], [], []>} : vector<8x32xf32>, vector<32x32xf32>, vector<8x32xf32> -> vector<8x32xf32>
    %85 = vector.extract_strided_slice %10 {offsets = [56, 0], sizes = [8, 32], strides = [1, 1]} : vector<64x32xf32> to vector<8x32xf32>
    %86 = arith.addf %84, %85 : vector<8x32xf32>
    %87 = math.tanh %86 : vector<8x32xf32>
    %cst_45 = arith.constant dense<0.000000e+00> : vector<8x32xf32>
    %88 = tpu.matmul %87, %12, %cst_45 {dimension_numbers = #tpu.dot_dimension_numbers<[1], [0], [0], [1], [0, 0, 1, 1], [], []>} : vector<8x32xf32>, vector<32x32xf32>, vector<8x32xf32> -> vector<8x32xf32>
    %cst_46 = arith.constant dense<0.000000e+00> : vector<8x32xf32>
    %89 = tpu.matmul %83, %13, %cst_46 {dimension_numbers = #tpu.dot_dimension_numbers<[1], [0], [0], [1], [0, 0, 1, 1], [], []>} : vector<8x32xf32>, vector<32x32xf32>, vector<8x32xf32> -> vector<8x32xf32>
    %90 = arith.addf %88, %89 : vector<8x32xf32>
    %91 = arith.addf %90, %16 : vector<8x32xf32>
    %92 = math.tanh %91 : vector<8x32xf32>
    %93 = vector.shape_cast %87 : vector<8x32xf32> to vector<1x8x32xf32>
    %94 = vector.shape_cast %92 : vector<8x32xf32> to vector<1x8x32xf32>
    %95 = tpu.concatenate %93, %94 in 0 : vector<1x8x32xf32>, vector<1x8x32xf32> -> vector<2x8x32xf32>
    %c0_47 = arith.constant 0 : index
    %c0_48 = arith.constant 0 : index
    %c0_49 = arith.constant 0 : index
    %96 = vector.load %arg13[%c0_47, %c0_48, %c0_49] : memref<2x8x32xf32, #tpu.memory_space<vmem>>, vector<2x8x32xf32>
    tpu.vector_store %arg13[%c0_47, %c0_48, %c0_49], %95 {strides = array<i32>} : memref<2x8x32xf32, #tpu.memory_space<vmem>>, vector<2x8x32xf32>,
    %97 = tpu.concatenate %29, %38, %47, %56, %65, %74, %83, %92 in 0 : vector<8x32xf32>, vector<8x32xf32>, vector<8x32xf32>, vector<8x32xf32>, vector<8x32xf32>, vector<8x32xf32>, vector<8x32xf32>, vector<8x32xf32> -> vector<64x32xf32>
    %c0_50 = arith.constant 0 : index
    %c0_51 = arith.constant 0 : index
    %98 = vector.load %arg10[%c0_50, %c0_51] : memref<32x128xf32, #tpu.memory_space<vmem>>, vector<32x128xf32>
    %cst_52 = arith.constant dense<0.000000e+00> : vector<64x128xf32>
    %99 = tpu.matmul %97, %98, %cst_52 {dimension_numbers = #tpu.dot_dimension_numbers<[1], [0], [0], [1], [0, 0, 1, 1], [], []>} : vector<64x32xf32>, vector<32x128xf32>, vector<64x128xf32> -> vector<64x128xf32>
    %c0_53 = arith.constant 0 : index
    %c0_54 = arith.constant 0 : index
    %100 = vector.load %arg11[%c0_53, %c0_54] : memref<1x128xf32, #tpu.memory_space<vmem>>, vector<1x128xf32>
    %101 = vector.broadcast %100 : vector<1x128xf32> to vector<64x128xf32>
    %102 = arith.addf %99, %101 : vector<64x128xf32>
    %c0_55 = arith.constant 0 : index
    %c0_56 = arith.constant 0 : index
    %103 = vector.load %arg12[%c0_55, %c0_56] : memref<64x128xf32, #tpu.memory_space<vmem>>, vector<64x128xf32>
    tpu.vector_store %arg12[%c0_55, %c0_56], %102 {strides = array<i32>} : memref<64x128xf32, #tpu.memory_space<vmem>>, vector<64x128xf32>,
    return
  }
}

</mosaic_0001>

<bundles_post_ra>
// kernel: tpu_custom_call.1
= control target key start
LH: loop header
LB: loop body
LE: loop exit
PB: predicated region body
PF: predicated region fallthrough
CT: control target
= control target key end

     0   :  { %19 = vsyncpa [#allocation3], 0  ;;  %s1583_s0 = inlined_call_operand.vmem [shape: f32[64,4], index: 0, kind: input, shape index: {}]   ;;  %s1584_s1 = inlined_call_operand.hbm [shape: f32[2,8,32], index: 1, kind: input, shape index: {}]   ;;  %s1585_s2 = inlined_call_operand.vmem [shape: f32[4,32], index: 2, kind: input, shape index: {}]   ;;  %s1586_s3 = inlined_call_operand.vmem [shape: f32[1,32], index: 3, kind: input, shape index: {}]   ;;  %s1587_s4 = inlined_call_operand.vmem [shape: f32[32,32], index: 4, kind: input, shape index: {}]   ;;  %s1588_s5 = inlined_call_operand.vmem [shape: f32[32,32], index: 5, kind: input, shape index: {}]   ;;  %s1589_s6 = inlined_call_operand.vmem [shape: f32[1,32], index: 6, kind: input, shape index: {}]   ;;  %s1590_s7 = inlined_call_operand.hbm [shape: f32[32,32], index: 7, kind: input, shape index: {}]   ;;  %s1591_s8 = inlined_call_operand.hbm [shape: f32[32,32], index: 8, kind: input, shape index: {}]   ;;  %s1592_s9 = inlined_call_operand.vmem [shape: f32[1,32], index: 9, kind: input, shape index: {}]   ;;  %s1593_s10 = inlined_call_operand.hbm [shape: f32[32,128], index: 10, kind: input, shape index: {}]   ;;  %s1594_s11 = inlined_call_operand.vmem [shape: f32[1,128], index: 11, kind: input, shape index: {}]   ;;  %s1595_s12 = inlined_call_operand.hbm [shape: f32[64,128], index: 12, kind: output, shape index: {0}]   ;;  %s1596_s13 = inlined_call_operand.hbm [shape: f32[2,8,32], index: 13, kind: output, shape index: {1}]  }
   0x1   :  { %20 = vsyncpa [#allocation6], 0 }
   0x2   :  { %21 = vsyncpa [#allocation9], 0 }
   0x3   :  { %22 = vsyncpa [#allocation4], 0 }
   0x4   :  { %23 = vsyncpa [#allocation12], 0  ;;  %s53_s27 = sshll.u32 %s1590_s7, 4  ;;  %s1190_s28 = smov [#allocation5]   ;;  %s54_s27 = int_to_ptr.hbm [resolvable:$true] %s53_s27 }
   0x5   :  { %s55_s29 = sshll.u32 %s1190_s28, 4  ;;  %s30_s15 = sshll.u32 %s1584_s1, 4  ;;  %s56_s29 = int_to_ptr.vmem [resolvable:$true] %s55_s29  ;;  %s31_s15 = int_to_ptr.hbm [resolvable:$true] %s30_s15 }
   0x6   :  { %s1191_s16 = smov 128   ;;  %s1192_s17 = smov 8  }
   0x7   :  { %61 = dma.hbm_to_vmem [thread:$0]  %s54_s27, 512, %s56_s29, [#allocation6], %s1191_s16, %s1191_s16, %s1192_s17  }
   0x8   :  { %s1193_s18 = smov [#allocation2]   ;;  %s66_s7 = sshll.u32 %s1591_s8, 4  ;;  %s67_s7 = int_to_ptr.hbm [resolvable:$true] %s66_s7 }
   0x9   :  { %s32_s19 = sshll.u32 %s1193_s18, 4  ;;  %s81_s23 = sshll.u32 %s1593_s10, 4  ;;  %s33_s19 = int_to_ptr.vmem [resolvable:$true] %s32_s19  ;;  %s82_s23 = int_to_ptr.hbm [resolvable:$true] %s81_s23 }
   0xa   :  { %38 = dma.hbm_to_vmem [thread:$0]  %s31_s15, 256, %s33_s19, [#allocation3], %s1191_s16, %s1191_s16, %s1192_s17  }
   0xb   :  { %s1194_s24 = smov [#allocation7]   ;;  %s1195_s26 = smov [#allocation8]  }
   0xc   :  { %s68_s25 = sshll.u32 %s1194_s24, 4  ;;  %s83_s8 = sshll.u32 %s1195_s26, 4  ;;  %s69_s25 = int_to_ptr.vmem [resolvable:$true] %s68_s25  ;;  %s84_s8 = int_to_ptr.vmem [resolvable:$true] %s83_s8 }
   0xd   :  { %74 = dma.hbm_to_vmem [thread:$0]  %s67_s7, 512, %s69_s25, [#allocation6], %s1191_s16, %s1191_s16, %s1192_s17  }
   0xe   :  { %89 = dma.hbm_to_vmem [thread:$0]  %s82_s23, 512, %s84_s8, [#allocation9], %s1191_s16, %s1191_s16, %s1192_s17  }
   0xf   :  { %1180 = dma.done.wait [#allocation3], 256  }
  0x10   :  { %1181 = vsyncadd [#allocation3], 4294967040 }
  0x11   :  { %1182 = dma.done.wait [#allocation6], 1024  }
  0x12   :  { %1183 = vsyncadd [#allocation6], 4294966272 }
  0x13   :  { %1184 = dma.done.wait [#allocation9], 512  }
  0x14   :  { %1185 = vsyncadd [#allocation9], 4294966784  ;;  %vm146_vm0 = vcmask 1043456   ;;  %vm121_vm1 = vcmask 31744   ;;  %v116_v0 = vld [vmem:[%s1585_s2] sm:$0xf] }
  0x15   :  { %v108_v1 = vld [vmem:[%s1583_s0] sm:$0xff]  ;;  %940 = vmatpush.msk.msra.mxu0 %vm146_vm0, %v116_v0  ;;  %989 = vmatpush.msk.msra.mxu1 %vm146_vm0, %v116_v0  ;;  %v110_v2 = vld [vmem:[%s1583_s0 + $0x10] sm:$0xff]  ;;  %v1311_v4 = vld [vmem:[%s1588_s5 + $0x18] sm:$0xff]  ;;  %vm199_vm2 = vcmask 261120   ;;  %s920_s8 = sshll.u32 %s1596_s13, 4  ;;  %s1197_s10 = smov [#allocation10]   ;;  %s921_s8 = int_to_ptr.hbm [resolvable:$true] %s920_s8 }
  0x16   :  { %v112_v3 = vld [vmem:[%s1583_s0 + $0x20] sm:$0xff]  ;;  %941 = vmatmul.msk.f32.vlgmr.msra.gmra.mxu0 %vm121_vm1, %v108_v1  ;;  %943 = vmatmul.msk.f32.vlgmr.msra.gmra.mxu1 %vm121_vm1, %v110_v2  ;;  %v194_v5 = vld [vmem:[%s1587_s4 + $0x18] sm:$0xff]  ;;  %v193_v6 = vld [vmem:[%s1587_s4 + $0x10] sm:$0xff]  ;;  %s905_s27 = sshll.u32 %s1197_s10, 4  ;;  %s907_s30 = sshll.u32 %s1595_s12, 4  ;;  %s906_s27 = int_to_ptr.vmem [resolvable:$true] %s905_s27  ;;  %s908_s30 = int_to_ptr.hbm [resolvable:$true] %s907_s30 }
  0x17   :  { %990 = vmatpush.msk.msra.mxu2 %vm146_vm0, %v116_v0  ;;  %236 = vmatpush.msrb.mxu1 %v194_v5  ;;  %v1324_v7 = vld [vmem:[%s1588_s5 + $0x10] sm:$0xff]  ;;  %v192_v8 = vld [vmem:[%s1587_s4 + $0x8] sm:$0xff]  ;;  %v191_v10 = vld [vmem:[%s1587_s4] sm:$0xff] }
  0x18   :  { %945 = vmatmul.msk.f32.vlgmr.msra.gmra.mxu2 %vm121_vm1, %v112_v3  ;;  %991 = vmatpush.msk.msra.mxu3 %vm146_vm0, %v116_v0  ;;  %v1334_v9 = vld [vmem:[%s1588_s5 + $0x8] sm:$0xff]  ;;  %v111_v12 = vld [vmem:[%s1583_s0 + $0x18] sm:$0xff]  ;;  %v1349_v13 = vld [vmem:[%s1588_s5] sm:$0xff] }
  0x19   :  { %299 = vmatpush.msrb.mxu2 %v1311_v4  ;;  %237 = vmatpush.msrb.mxu1 %v193_v6  ;;  %v109_v11 = vld [vmem:[%s1583_s0 + $0x8] sm:$0xff]  ;;  %v281_v15 = vld [vmem:[#allocation2] sm:$0xff]  ;;  %v114_v16 = vld [vmem:[%s1583_s0 + $0x30] sm:$0xff] }
  0x1a   :  { %v113_v14 = vld [vmem:[%s1583_s0 + $0x28] sm:$0xff]  ;;  %947 = vmatmul.msk.f32.vlgmr.msra.gmra.mxu3 %vm121_vm1, %v114_v16  ;;  %v1367_v17 = vld [vmem:[%s1586_s3] ss:$0 sm:$0xff]  ;;  %v115_v22 = vld [vmem:[%s1583_s0 + $0x38] sm:$0xff] }
  0x1b   :  { %300 = vmatpush.msrb.mxu2 %v1324_v7  ;;  %238 = vmatpush.msrb.mxu1 %v192_v8  ;;  %v1371_v20 = vld [vmem:[#allocation7 + $0x18] sm:$0xff]  ;;  %v1373_v21 = vld [vmem:[#allocation7 + $0x10] sm:$0xff]  ;;  %v1385_v26 = vld [vmem:[#allocation7 + $0x8] sm:$0xff] }
  0x1c   :  { %323 = vmatpush.msrb.mxu3 %v1371_v20  ;;  %668 = vmatpush.msrb.mxu0 %v1371_v20  ;;  %v1397_v34 = vld [vmem:[#allocation7] sm:$0xff]  ;;  %v283_v35 = vld [vmem:[#allocation2 + $0x8] sm:$0xff]  ;;  %v1406_v37 = vld [vmem:[#allocation5 + $0x10] sm:$0xff] }
  0x1d   :  { %301 = vmatpush.msrb.mxu2 %v1334_v9  ;;  %239 = vmatpush.msrb.mxu1 %v191_v10  ;;  %v1402_v36 = vld [vmem:[#allocation5 + $0x18] sm:$0xff]  ;;  %v1408_v38 = vld [vmem:[#allocation5 + $0x8] sm:$0xff]  ;;  %v1414_v39 = vld [vmem:[#allocation5] sm:$0xff] }
  0x1e   :  { %942 = vmatmul.msk.f32.gmra.mxu0 %vm121_vm1, %v109_v11  ;;  %944 = vmatmul.msk.f32.gmra.mxu1 %vm121_vm1, %v111_v12  ;;  %v1441_v40 = vld [vmem:[%s1589_s6] ss:$0 sm:$0xff] }
  0x1f   :  { %302 = vmatpush.msrb.mxu2 %v1349_v13  ;;  %324 = vmatpush.msrb.mxu3 %v1373_v21  ;;  %v1462_v53 = vld [vmem:[%s1592_s9] ss:$0 sm:$0xff] }
  0x20   :  { %946 = vmatmul.msk.f32.gmra.mxu2 %vm121_vm1, %v113_v14  ;;  %669 = vmatpush.msrb.mxu0 %v1373_v21 }
  0x21   :  { %325 = vmatpush.msrb.mxu3 %v1385_v26  ;;  %346 = vmatpush.msra.mxu2 %v1402_v36 }
  0x22   :  { %948 = vmatmul.msk.f32.gmra.mxu3 %vm121_vm1, %v115_v22  ;;  %670 = vmatpush.msrb.mxu0 %v1385_v26 }
  0x23   :  { %326 = vmatpush.msrb.mxu3 %v1397_v34  ;;  %691 = vmatpush.msra.mxu1 %v1402_v36 }
  0x24   :  { %671 = vmatpush.msrb.mxu0 %v1397_v34  ;;  %347 = vmatpush.msra.mxu2 %v1406_v37 }
  0x25   :  { %368 = vmatpush.msra.mxu3 %v1311_v4  ;;  %692 = vmatpush.msra.mxu1 %v1406_v37 }
  0x26   :  { %760 = vmatpush.msra.mxu0 %v1402_v36  ;;  %348 = vmatpush.msra.mxu2 %v1408_v38 }
  0x27   :  { %369 = vmatpush.msra.mxu3 %v1324_v7  ;;  %693 = vmatpush.msra.mxu1 %v1408_v38 }
  0x28   :  { %957 = vmatmul.msk.f32.vlgmr.msrb.gmra.mxu2 %vm199_vm2, %v281_v15  ;;  %761 = vmatpush.msra.mxu0 %v1406_v37 }
  0x29   :  { %370 = vmatpush.msra.mxu3 %v1334_v9  ;;  %349 = vmatpush.msra.mxu2 %v1414_v39 }
  0x2a   :  { %958 = vmatmul.msk.f32.vlgmr.msrb.gmra.mxu3 %vm199_vm2, %v283_v35  ;;  %762 = vmatpush.msra.mxu0 %v1408_v38 }
  0x2b   :  { %371 = vmatpush.msra.mxu3 %v1349_v13  ;;  %392 = vmatpush.msrb.mxu2 %v1371_v20 }
  0x2c   :  { %694 = vmatpush.msra.mxu1 %v1414_v39  ;;  %763 = vmatpush.msra.mxu0 %v1414_v39 }
  0x2d   :  { %415 = vmatpush.msrb.mxu3 %v1402_v36  ;;  %393 = vmatpush.msrb.mxu2 %v1373_v21 }
  0x2f   :  { %416 = vmatpush.msrb.mxu3 %v1406_v37  ;;  %394 = vmatpush.msrb.mxu2 %v1385_v26 }
  0x31   :  { %417 = vmatpush.msrb.mxu3 %v1408_v38  ;;  %395 = vmatpush.msrb.mxu2 %v1397_v34 }
  0x33   :  { %418 = vmatpush.msrb.mxu3 %v1414_v39 }
  0x93   :  { %v167_v18 = vpop.f32.mrf.mxu0  ;;  %v173_v25 = vpop.f32.mrf.mxu1 }
  0x94   :  { %v168_v19 = vadd.f32 %v1367_v17, %v167_v18  ;;  %v174_v27 = vadd.f32 %v1367_v17, %v173_v25 }
  0x96   :  { %949 = vmatmul.msk.f32.vlgmr.msrb.gmra.mxu1 %vm199_vm2, %v168_v19 }
  0x97   :  { %782 = vmatpush.msrb.mxu1 %v1311_v4 }
  0x99   :  { %783 = vmatpush.msrb.mxu1 %v1324_v7 }
  0x9b   :  { %v170_v23 = vpop.f32.mrf.mxu0  ;;  %v176_v28 = vpop.f32.mrf.mxu1  ;;  %784 = vmatpush.msrb.mxu1 %v1334_v9 }
  0x9c   :  { %v171_v24 = vadd.f32 %v1367_v17, %v170_v23  ;;  %v177_v29 = vadd.f32 %v1367_v17, %v176_v28  ;;  %v179_v30 = vpop.f32.mrf.mxu2 }
  0x9d   :  { %v180_v31 = vadd.f32 %v1367_v17, %v179_v30  ;;  %785 = vmatpush.msrb.mxu1 %v1349_v13  ;;  %v185_v44 = vpop.f32.mrf.mxu3 }
  0x9e   :  { %950 = vmatmul.msk.f32.gmra.mxu1 %vm199_vm2, %v171_v24  ;;  %v186_v45 = vadd.f32 %v1367_v17, %v185_v44 }
  0xa4   :  { %v182_v32 = vpop.f32.mrf.mxu2 }
  0xa5   :  { %v183_v33 = vadd.f32 %v1367_v17, %v182_v32  ;;  %v188_v47 = vpop.f32.mrf.mxu3 }
  0xa6   :  { %951 = vmatmul.msk.f32.gmra.mxu1 %vm199_vm2, %v174_v27  ;;  %v189_v48 = vadd.f32 %v1367_v17, %v188_v47 }
  0xac   :  { %v304_v42 = vpop.f32.mrf.mxu2 }
  0xad   :  { %v328_v50 = vpop.f32.mrf.mxu3 }
  0xae   :  { %952 = vmatmul.msk.f32.gmra.mxu1 %vm199_vm2, %v177_v29 }
  0xb6   :  { %953 = vmatmul.msk.f32.gmra.mxu1 %vm199_vm2, %v180_v31 }
  0xbe   :  { %954 = vmatmul.msk.f32.gmra.mxu1 %vm199_vm2, %v183_v33 }
  0xc6   :  { %955 = vmatmul.msk.f32.gmra.mxu1 %vm199_vm2, %v186_v45 }
  0xce   :  { %956 = vmatmul.msk.f32.gmra.mxu1 %vm199_vm2, %v189_v48 }
 0x113   :  { %v241_v41 = vpop.f32.mrf.mxu1 }
 0x114   :  { %v242_v43 = vadd.f32 %v1441_v40, %v241_v41  ;;  %v842_v41 = vld [vmem:[#allocation8 + $0x8] sm:$0xff] }
 0x116   :  { %v305_v46 = vadd.f32 %v304_v42, %v242_v43  ;;  %v841_v42 = vld [vmem:[#allocation8] sm:$0xff] }
 0x118   :  { %1004 = vtanh.f32 %v305_v46 }
 0x11b   :  { %v244_v51 = vpop.f32.mrf.mxu1 }
 0x11c   :  { %v245_v52 = vadd.f32 %v1441_v40, %v244_v51 }
 0x11e   :  { %v1005_v49 = vpop.eup %1004 }
 0x11f   :  { %959 = vmatmul.msk.f32.vlgmr.msra.gmra.mxu2 %vm199_vm2, %v1005_v49  ;;  %960 = vmatmul.msk.f32.vlgmr.msra.gmra.mxu3 %vm199_vm2, %v1005_v49 }
 0x120   :  { %437 = vmatpush.msra.mxu2 %v1311_v4  ;;  %461 = vmatpush.msra.mxu3 %v1371_v20 }
 0x122   :  { %438 = vmatpush.msra.mxu2 %v1324_v7  ;;  %462 = vmatpush.msra.mxu3 %v1373_v21 }
 0x123   :  { %v247_v1 = vpop.f32.mrf.mxu1 }
 0x124   :  { %439 = vmatpush.msra.mxu2 %v1334_v9  ;;  %463 = vmatpush.msra.mxu3 %v1385_v26  ;;  %v248_v2 = vadd.f32 %v1441_v40, %v247_v1 }
 0x126   :  { %440 = vmatpush.msra.mxu2 %v1349_v13  ;;  %464 = vmatpush.msra.mxu3 %v1397_v34 }
 0x12b   :  { %v250_v11 = vpop.f32.mrf.mxu1 }
 0x12c   :  { %v251_v14 = vadd.f32 %v1441_v40, %v250_v11 }
 0x133   :  { %v253_v27 = vpop.f32.mrf.mxu1 }
 0x134   :  { %v254_v29 = vadd.f32 %v1441_v40, %v253_v27 }
 0x1a2   :  { %v351_v54 = vpop.f32.mrf.mxu2  ;;  %v373_v55 = vpop.f32.mrf.mxu3 }
 0x1a3   :  { %v352_v56 = vadd.f32 %v351_v54, %v328_v50  ;;  %v374_v57 = vadd.f32 %v373_v55, %v245_v52 }
 0x1a5   :  { %v354_v58 = vadd.f32 %v1462_v53, %v352_v56  ;;  %1006 = vtanh.f32 %v374_v57 }
 0x1a7   :  { %1008 = vtanh.f32 %v354_v58 }
 0x1ab   :  { %v1007_v59 = vpop.eup %1006 }
 0x1ac   :  { %962 = vmatmul.msk.f32.vlgmr.msrb.gmra.mxu3 %vm199_vm2, %v1007_v59 }
 0x1ad   :  { %v1466_v60 = vpop.eup %1008  ;;  %506 = vmatpush.msrb.mxu3 %v1311_v4 }
 0x1ae   :  { %961 = vmatmul.msk.f32.vlgmr.msrb.gmra.mxu2 %vm199_vm2, %v1466_v60 }
 0x1af   :  { %484 = vmatpush.msrb.mxu2 %v1402_v36  ;;  %507 = vmatpush.msrb.mxu3 %v1324_v7 }
 0x1b1   :  { %485 = vmatpush.msrb.mxu2 %v1406_v37  ;;  %508 = vmatpush.msrb.mxu3 %v1334_v9 }
 0x1b3   :  { %486 = vmatpush.msrb.mxu2 %v1408_v38  ;;  %509 = vmatpush.msrb.mxu3 %v1349_v13 }
 0x1b5   :  { %487 = vmatpush.msrb.mxu2 %v1414_v39 }
 0x1b6   :  { %963 = vmatmul.msk.f32.vlgmr.msra.gmra.mxu2 %vm199_vm2, %v1007_v59 }
 0x1b7   :  { %530 = vmatpush.msra.mxu2 %v1371_v20 }
 0x1b9   :  { %531 = vmatpush.msra.mxu2 %v1373_v21 }
 0x1bb   :  { %532 = vmatpush.msra.mxu2 %v1385_v26 }
 0x1bd   :  { %533 = vmatpush.msra.mxu2 %v1397_v34 }
 0x22f   :  { %v420_v61 = vpop.f32.mrf.mxu3 }
 0x231   :  { %v397_v62 = vpop.f32.mrf.mxu2 }
 0x232   :  { %v421_v63 = vadd.f32 %v420_v61, %v397_v62  ;;  %v1003_v61 = vld [vmem:[%s1594_s11] ss:$0 sm:$0xff]  ;;  %s1196_s11 = smov [#allocation11]  }
 0x233   :  { %s918_s24 = sshll.u32 %s1196_s11, 4  ;;  %s919_s24 = int_to_ptr.vmem [resolvable:$true] %s918_s24 }
 0x234   :  { %v423_v0 = vadd.f32 %v1462_v53, %v421_v63 }
 0x236   :  { %1010 = vtanh.f32 %v423_v0 }
 0x239   :  { %v442_v3 = vpop.f32.mrf.mxu2 }
 0x23a   :  { %v443_v5 = vadd.f32 %v442_v3, %v248_v2 }
 0x23c   :  { %v1485_v6 = vpop.eup %1010  ;;  %1012 = vtanh.f32 %v443_v5 }
 0x23d   :  { %964 = vmatmul.msk.f32.vlgmr.msra.gmra.mxu3 %vm199_vm2, %v1485_v6 }
 0x23e   :  { %553 = vmatpush.msra.mxu3 %v1402_v36 }
 0x240   :  { %554 = vmatpush.msra.mxu3 %v1406_v37 }
 0x242   :  { %v1013_v8 = vpop.eup %1012  ;;  %555 = vmatpush.msra.mxu3 %v1408_v38 }
 0x243   :  { %965 = vmatmul.msk.f32.vlgmr.msrb.gmra.mxu2 %vm199_vm2, %v1013_v8 }
 0x244   :  { %556 = vmatpush.msra.mxu3 %v1414_v39  ;;  %575 = vmatpush.msrb.mxu2 %v1311_v4 }
 0x245   :  { %966 = vmatmul.msk.f32.vlgmr.msrb.gmra.mxu3 %vm199_vm2, %v1013_v8 }
 0x246   :  { %576 = vmatpush.msrb.mxu2 %v1324_v7  ;;  %599 = vmatpush.msrb.mxu3 %v1371_v20 }
 0x248   :  { %577 = vmatpush.msrb.mxu2 %v1334_v9  ;;  %600 = vmatpush.msrb.mxu3 %v1373_v21 }
 0x24a   :  { %578 = vmatpush.msrb.mxu2 %v1349_v13  ;;  %601 = vmatpush.msrb.mxu3 %v1385_v26 }
 0x24c   :  { %602 = vmatpush.msrb.mxu3 %v1397_v34 }
 0x2c0   :  { %v466_v10 = vpop.f32.mrf.mxu3 }
 0x2c6   :  { %v489_v12 = vpop.f32.mrf.mxu2 }
 0x2c7   :  { %v490_v15 = vadd.f32 %v489_v12, %v466_v10 }
 0x2c8   :  { %v511_v16 = vpop.f32.mrf.mxu3 }
 0x2c9   :  { %v492_v17 = vadd.f32 %v1462_v53, %v490_v15  ;;  %v512_v18 = vadd.f32 %v511_v16, %v251_v14 }
 0x2cb   :  { %1014 = vtanh.f32 %v492_v17 }
 0x2cc   :  { %1016 = vtanh.f32 %v512_v18 }
 0x2d1   :  { %v1505_v19 = vpop.eup %1014 }
 0x2d2   :  { %v1017_v22 = vpop.eup %1016  ;;  %967 = vmatmul.msk.f32.vlgmr.msra.gmra.mxu2 %vm199_vm2, %v1505_v19 }
 0x2d3   :  { %968 = vmatmul.msk.f32.vlgmr.msra.gmra.mxu3 %vm199_vm2, %v1017_v22  ;;  %622 = vmatpush.msra.mxu2 %v1402_v36 }
 0x2d4   :  { %644 = vmatpush.msra.mxu3 %v1311_v4 }
 0x2d5   :  { %623 = vmatpush.msra.mxu2 %v1406_v37 }
 0x2d6   :  { %645 = vmatpush.msra.mxu3 %v1324_v7 }
 0x2d7   :  { %624 = vmatpush.msra.mxu2 %v1408_v38 }
 0x2d8   :  { %646 = vmatpush.msra.mxu3 %v1334_v9 }
 0x2d9   :  { %625 = vmatpush.msra.mxu2 %v1414_v39 }
 0x2da   :  { %969 = vmatmul.msk.f32.vlgmr.msrb.gmra.mxu2 %vm199_vm2, %v1017_v22  ;;  %647 = vmatpush.msra.mxu3 %v1349_v13 }
 0x2db   :  { %713 = vmatpush.msrb.mxu2 %v1311_v4 }
 0x2dd   :  { %714 = vmatpush.msrb.mxu2 %v1324_v7 }
 0x2df   :  { %715 = vmatpush.msrb.mxu2 %v1334_v9  ;;  %v256_v9 = vpop.f32.mrf.mxu1 }
 0x2e0   :  { %v257_v33 = vadd.f32 %v1441_v40, %v256_v9 }
 0x2e1   :  { %716 = vmatpush.msrb.mxu2 %v1349_v13 }
 0x355   :  { %v535_v23 = vpop.f32.mrf.mxu2 }
 0x356   :  { %v558_v24 = vpop.f32.mrf.mxu3 }
 0x357   :  { %v559_v25 = vadd.f32 %v558_v24, %v535_v23 }
 0x359   :  { %v561_v28 = vadd.f32 %v1462_v53, %v559_v25 }
 0x35b   :  { %1018 = vtanh.f32 %v561_v28 }
 0x35d   :  { %v580_v30 = vpop.f32.mrf.mxu2 }
 0x35e   :  { %v581_v31 = vadd.f32 %v580_v30, %v254_v29 }
 0x360   :  { %1020 = vtanh.f32 %v581_v31 }
 0x361   :  { %v1019_v32 = vpop.eup %1018 }
 0x362   :  { %970 = vmatmul.msk.f32.vlgmr.msrb.gmra.mxu3 %vm199_vm2, %v1019_v32 }
 0x363   :  { %737 = vmatpush.msrb.mxu3 %v1371_v20 }
 0x365   :  { %738 = vmatpush.msrb.mxu3 %v1373_v21 }
 0x366   :  { %v1021_v4 = vpop.eup %1020 }
 0x367   :  { %971 = vmatmul.msk.f32.vlgmr.msra.gmra.mxu2 %vm199_vm2, %v1021_v4  ;;  %739 = vmatpush.msrb.mxu3 %v1385_v26 }
 0x368   :  { %806 = vmatpush.msra.mxu2 %v1371_v20 }
 0x369   :  { %740 = vmatpush.msrb.mxu3 %v1397_v34 }
 0x36a   :  { %972 = vmatmul.msk.f32.vlgmr.msra.gmra.mxu3 %vm199_vm2, %v1021_v4  ;;  %807 = vmatpush.msra.mxu2 %v1373_v21 }
 0x36b   :  { %829 = vmatpush.msra.mxu3 %v1402_v36 }
 0x36c   :  { %808 = vmatpush.msra.mxu2 %v1385_v26 }
 0x36d   :  { %830 = vmatpush.msra.mxu3 %v1406_v37 }
 0x36e   :  { %809 = vmatpush.msra.mxu2 %v1397_v34  ;;  %v259_v34 = vpop.f32.mrf.mxu1 }
 0x36f   :  { %831 = vmatpush.msra.mxu3 %v1408_v38  ;;  %v844_v38 = vld [vmem:[#allocation8 + $0x18] sm:$0xff]  ;;  %v260_v48 = vadd.f32 %v1441_v40, %v259_v34 }
 0x371   :  { %832 = vmatpush.msra.mxu3 %v1414_v39  ;;  %v843_v39 = vld [vmem:[#allocation8 + $0x10] sm:$0xff] }
 0x376   :  { %v262_v43 = vpop.f32.mrf.mxu1 }
 0x377   :  { %v263_v54 = vadd.f32 %v1441_v40, %v262_v43 }
 0x3e5   :  { %v604_v7 = vpop.f32.mrf.mxu3 }
 0x3ea   :  { %v627_v13 = vpop.f32.mrf.mxu2 }
 0x3eb   :  { %v628_v20 = vadd.f32 %v627_v13, %v604_v7 }
 0x3ed   :  { %v630_v21 = vadd.f32 %v1462_v53, %v628_v20  ;;  %v649_v35 = vpop.f32.mrf.mxu3 }
 0x3ee   :  { %v650_v36 = vadd.f32 %v649_v35, %v257_v33 }
 0x3ef   :  { %1022 = vtanh.f32 %v630_v21 }
 0x3f0   :  { %1024 = vtanh.f32 %v650_v36 }
 0x3f5   :  { %v1023_v26 = vpop.eup %1022 }
 0x3f6   :  { %v1025_v37 = vpop.eup %1024  ;;  %973 = vmatmul.msk.f32.vlgmr.msrb.gmra.mxu0 %vm199_vm2, %v1023_v26 }
 0x3f7   :  { %974 = vmatmul.msk.f32.vlgmr.msra.gmra.mxu1 %vm199_vm2, %v1025_v37  ;;  %975 = vmatmul.msk.f32.vlgmr.msrb.gmra.mxu2 %vm199_vm2, %v1025_v37 }
 0x3f8   :  { %864 = vmatpush.msrb.mxu0 %v844_v38 }
 0x3fa   :  { %865 = vmatpush.msrb.mxu0 %v843_v39 }
 0x3fc   :  { %866 = vmatpush.msrb.mxu0 %v842_v41 }
 0x3fe   :  { %867 = vmatpush.msrb.mxu0 %v841_v42 }
 0x473   :  { %v673_v44 = vpop.f32.mrf.mxu0 }
 0x474   :  { %v696_v45 = vpop.f32.mrf.mxu1 }
 0x475   :  { %v697_v46 = vadd.f32 %v696_v45, %v673_v44 }
 0x477   :  { %v699_v47 = vadd.f32 %v1462_v53, %v697_v46 }
 0x479   :  { %1026 = vtanh.f32 %v699_v47 }
 0x47a   :  { %v718_v49 = vpop.f32.mrf.mxu2 }
 0x47b   :  { %v719_v50 = vadd.f32 %v718_v49, %v260_v48 }
 0x47d   :  { %1028 = vtanh.f32 %v719_v50 }
 0x47f   :  { %v1027_v51 = vpop.eup %1026 }
 0x480   :  { %976 = vmatmul.msk.f32.vlgmr.msrb.gmra.mxu3 %vm199_vm2, %v1027_v51 }
 0x483   :  { %v1029_v52 = vpop.eup %1028 }
 0x484   :  { %977 = vmatmul.msk.f32.vlgmr.msra.gmra.mxu0 %vm199_vm2, %v1029_v52  ;;  %978 = vmatmul.msk.f32.vlgmr.msrb.gmra.mxu1 %vm199_vm2, %v1029_v52 }
 0x48c   :  { %981 = vmatmul.msk.f32.vlgmr.msrb.gmra.mxu0 %vm199_vm2, %v1466_v60 }
 0x494   :  { %982 = vmatmul.msk.f32.gmra.mxu0 %vm199_vm2, %v1485_v6 }
 0x49c   :  { %983 = vmatmul.msk.f32.gmra.mxu0 %vm199_vm2, %v1505_v19 }
 0x4a4   :  { %984 = vmatmul.msk.f32.gmra.mxu0 %vm199_vm2, %v1019_v32 }
 0x4ac   :  { %985 = vmatmul.msk.f32.gmra.mxu0 %vm199_vm2, %v1023_v26 }
 0x4b4   :  { %986 = vmatmul.msk.f32.gmra.mxu0 %vm199_vm2, %v1027_v51 }
 0x501   :  { %v765_v55 = vpop.f32.mrf.mxu0  ;;  %v787_v56 = vpop.f32.mrf.mxu1 }
 0x502   :  { %v788_v57 = vadd.f32 %v787_v56, %v263_v54 }
 0x503   :  { %v742_v58 = vpop.f32.mrf.mxu3 }
 0x504   :  { %1030 = vtanh.f32 %v788_v57  ;;  %v766_v59 = vadd.f32 %v765_v55, %v742_v58 }
 0x506   :  { %v768_v60 = vadd.f32 %v1462_v53, %v766_v59 }
 0x508   :  { %1032 = vtanh.f32 %v768_v60 }
 0x509   :  { %v869_v62 = vpop.f32.mrf.mxu0 }
 0x50a   :  { %v1031_v63 = vpop.eup %1030  ;;  %v870_v0 = vadd.f32 %v1003_v61, %v869_v62 }
 0x50b   :  { %839 = vst.msk [vmem:[#allocation11] sm:$0xff] %vm199_vm2, %v1031_v63  ;;  %980 = vmatmul.msk.f32.vlgmr.msra.gmra.mxu3 %vm199_vm2, %v1031_v63 }
 0x50c   :  { %893 = vst [vmem:[#allocation10] sm:$0xff] %v870_v0 }
 0x50e   :  { %v1033_v40 = vpop.eup %1032 }
 0x50f   :  { %979 = vmatmul.msk.f32.vlgmr.msra.gmra.mxu2 %vm199_vm2, %v1033_v40  ;;  %987 = vmatmul.msk.f32.gmra.mxu0 %vm199_vm2, %v1033_v40 }
 0x511   :  { %v872_v1 = vpop.f32.mrf.mxu0 }
 0x512   :  { %v873_v2 = vadd.f32 %v1003_v61, %v872_v1 }
 0x514   :  { %894 = vst [vmem:[#allocation10 + $0x8] sm:$0xff] %v873_v2 }
 0x519   :  { %v875_v3 = vpop.f32.mrf.mxu0 }
 0x51a   :  { %v876_v5 = vadd.f32 %v1003_v61, %v875_v3 }
 0x51c   :  { %895 = vst [vmem:[#allocation10 + $0x10] sm:$0xff] %v876_v5 }
 0x521   :  { %v878_v6 = vpop.f32.mrf.mxu0 }
 0x522   :  { %v879_v8 = vadd.f32 %v1003_v61, %v878_v6 }
 0x524   :  { %896 = vst [vmem:[#allocation10 + $0x18] sm:$0xff] %v879_v8 }
 0x529   :  { %v881_v10 = vpop.f32.mrf.mxu0 }
 0x52a   :  { %v882_v11 = vadd.f32 %v1003_v61, %v881_v10 }
 0x52c   :  { %897 = vst [vmem:[#allocation10 + $0x20] sm:$0xff] %v882_v11 }
 0x531   :  { %v884_v12 = vpop.f32.mrf.mxu0 }
 0x532   :  { %v885_v14 = vadd.f32 %v1003_v61, %v884_v12 }
 0x534   :  { %898 = vst [vmem:[#allocation10 + $0x28] sm:$0xff] %v885_v14 }
 0x58c   :  { %v887_v15 = vpop.f32.mrf.mxu0 }
 0x58d   :  { %v888_v16 = vadd.f32 %v1003_v61, %v887_v15 }
 0x58e   :  { %v834_v17 = vpop.f32.mrf.mxu3 }
 0x58f   :  { %899 = vst [vmem:[#allocation10 + $0x30] sm:$0xff] %v888_v16 }
 0x592   :  { %v811_v18 = vpop.f32.mrf.mxu2 }
 0x593   :  { %v835_v19 = vadd.f32 %v834_v17, %v811_v18 }
 0x595   :  { %v837_v22 = vadd.f32 %v1462_v53, %v835_v19 }
 0x597   :  { %1034 = vtanh.f32 %v837_v22 }
 0x59d   :  { %v1035_v23 = vpop.eup %1034 }
 0x59e   :  { %840 = vst.msk [vmem:[#allocation11 + $0x8] sm:$0xff] %vm199_vm2, %v1035_v23  ;;  %988 = vmatmul.msk.f32.gmra.mxu0 %vm199_vm2, %v1035_v23 }
 0x59f   :  { %926 = dma.vmem_to_hbm [thread:$0]  %s919_s24, 256, %s921_s8, [#allocation12], %s1191_s16, %s1191_s16, %s1192_s17  }
 0x61b   :  { %v890_v53 = vpop.f32.mrf.mxu0 }
 0x61c   :  { %v891_v24 = vadd.f32 %v1003_v61, %v890_v53 }
 0x61e   :  { %900 = vst [vmem:[#allocation10 + $0x38] sm:$0xff] %v891_v24 }
 0x61f   :  { %913 = dma.vmem_to_hbm [thread:$0]  %s906_s27, 1024, %s908_s30, [#allocation4], %s1191_s16, %s1191_s16, %s1192_s17  }
 0x620   :  { %1186 = dma.done.wait [#allocation4], 1024  }
 0x621   :  { %1187 = vsyncadd [#allocation4], 4294966272 }
 0x622   :  { %1188 = dma.done.wait [#allocation12], 256  }
 0x623   :  { %1189 = vsyncadd [#allocation12], 4294967040 }
 0x624   :  { %935 = vsyncpa [#allocation3], 1 }
 0x625   :  { %936 = vsyncpa [#allocation6], 1 }
 0x626   :  { %937 = vsyncpa [#allocation9], 1 }
 0x627   :  { %938 = vsyncpa [#allocation4], 1 }
 0x628   :  { %939 = vsyncpa [#allocation12], 1 }

</bundles_post_ra>
